<compile_context>
chip_gen: v7x
topology: tpu7x:2x2x1
jax: 0.10.0
libtpu: 0.0.40
codegen_flags: <defaults>
</compile_context>

<pallas_src>
import jax
import jax.numpy as jnp
from jax.experimental import pallas as pl
from jax.experimental.pallas import tpu as pltpu


def _round_up(x, m):
    return ((x + m - 1) // m) * m


def _glu_kernel(x_ref, w_ref, b_ref, out_ref):
    """One (tile_m, K) x tile against one fused (K, 2*tile_n) weight slab.

    The fused slab holds [Wa_tile | Wg_tile] side by side; the fused output
    slab holds [act*gate | gate] so every store is lane-dense (>=128 wide).
    """
    tn = out_ref.shape[-1] // 2          # static tile_n
    x = x_ref[...]
    # single MXU pass covering both branches, f32 accumulate
    lin = jnp.dot(x, w_ref[...], preferred_element_type=jnp.float32) + b_ref[...]
    act = lin[:, :tn]
    gate = jax.nn.sigmoid(lin[:, tn:])   # EUP, f32
    fused = jnp.concatenate([act * gate, gate], axis=-1)
    out_ref[...] = fused.astype(out_ref.dtype)


def glu_forward(x, wa, ba, wg, bg, *, tile_m=256, tile_n=None,
                use_bf16_matmul=False):
    """GLU forward. x: (..., input_size); wa/wg: (input_size, hidden) (= PyTorch
    weight.T); ba/bg: (hidden,). Returns (activation * gate, gate)."""
    orig_shape = x.shape
    K = orig_shape[-1]
    H = wa.shape[1]
    out_dtype = x.dtype

    x2 = x.reshape(-1, K)
    M = x2.shape[0]

    in_dtype = jnp.bfloat16 if use_bf16_matmul else x2.dtype
    in_bytes = jnp.dtype(in_dtype).itemsize
    sub = 16 if in_bytes == 2 else 8

    # ---- M tiling: fixed sublane-aligned tile, ragged tail padded ----------
    tile_m = max(sub, (int(tile_m) // sub) * sub)
    tile_m = min(tile_m, _round_up(M, sub))      # don't over-pad tiny inputs
    Mp = _round_up(M, tile_m)

    # ---- N (hidden) tiling: lane-dense, multiple of 128 ---------------------
    Hp = _round_up(H, 128)
    n_units = Hp // 128
    if tile_n is None:
        # Largest 128-multiple dividing Hp whose fused (K, 2*tile_n) slab stays
        # within a modest resident-weight budget (binding case: v7x 64 MiB VMEM).
        weight_budget = 16 * 2**20
        tile_n = 128
        for d in range(n_units, 0, -1):
            if n_units % d == 0 and K * (2 * d * 128) * in_bytes <= weight_budget:
                tile_n = d * 128
                break
    else:
        tile_n = min(_round_up(int(tile_n), 128), Hp)
        if Hp % tile_n != 0:
            raise ValueError(f"tile_n={tile_n} must divide padded hidden {Hp}")
    n_tiles = Hp // tile_n

    # ---- pad + fuse weights: per-N-tile interleaved [Wa_j | Wg_j] ------------
    if Hp != H:
        wa = jnp.pad(wa, ((0, 0), (0, Hp - H)))
        wg = jnp.pad(wg, ((0, 0), (0, Hp - H)))
        ba = jnp.pad(ba, (0, Hp - H))
        bg = jnp.pad(bg, (0, Hp - H))
    w_fused = jnp.stack([wa.reshape(K, n_tiles, tile_n),
                         wg.reshape(K, n_tiles, tile_n)], axis=2)
    w_fused = w_fused.reshape(K, 2 * Hp).astype(in_dtype)
    b_fused = jnp.stack([ba.reshape(n_tiles, tile_n),
                         bg.reshape(n_tiles, tile_n)], axis=1)
    b_fused = b_fused.reshape(1, 2 * Hp).astype(jnp.float32)

    if Mp != M:
        x2 = jnp.pad(x2, ((0, Mp - M), (0, 0)))
    x2 = x2.astype(in_dtype)

    grid = (Mp // tile_m, n_tiles)

    # Explicit scoped-VMEM budget: double-buffered x / weight slab / bias /
    # fused output, with headroom, capped at 56 MiB (safe on v7x's 64 MiB).
    out_bytes = jnp.dtype(out_dtype).itemsize
    est = (2 * tile_m * K * in_bytes
           + 2 * K * 2 * tile_n * in_bytes
           + 2 * 2 * tile_n * 4
           + 2 * tile_m * 2 * tile_n * out_bytes)
    vmem_limit = int(min(max(4 * est, 32 * 2**20), 56 * 2**20))

    fused_out = pl.pallas_call(
        _glu_kernel,
        out_shape=jax.ShapeDtypeStruct((Mp, 2 * Hp), out_dtype),
        grid_spec=pltpu.PrefetchScalarGridSpec(
            num_scalar_prefetch=0,
            grid=grid,
            in_specs=[
                pl.BlockSpec((tile_m, K), lambda i, j: (i, 0)),      # x tile
                pl.BlockSpec((K, 2 * tile_n), lambda i, j: (0, j)),  # fused W slab
                pl.BlockSpec((1, 2 * tile_n), lambda i, j: (0, j)),  # fused bias
            ],
            out_specs=pl.BlockSpec((tile_m, 2 * tile_n), lambda i, j: (i, j)),
        ),
        compiler_params=pltpu.CompilerParams(
            dimension_semantics=("parallel", "parallel"),
            vmem_limit_bytes=vmem_limit),
    )(x2, w_fused, b_fused)

    # un-interleave [act*gate | gate] per N tile, drop M / H padding
    fused_out = fused_out.reshape(Mp, n_tiles, 2, tile_n)
    act_gated = fused_out[:, :, 0, :].reshape(Mp, Hp)[:M, :H]
    gate = fused_out[:, :, 1, :].reshape(Mp, Hp)[:M, :H]

    out_shape = orig_shape[:-1] + (H,)
    return act_gated.reshape(out_shape), gate.reshape(out_shape)


def init_glu_params(key, input_size, hidden_size, dtype=jnp.float32):
    """Deterministic init mirroring nn.Linear default (uniform +-1/sqrt(fan_in))."""
    k1, k2, k3, k4 = jax.random.split(key, 4)
    bound = 1.0 / (input_size ** 0.5)
    # stored as (input_size, hidden) == PyTorch weight.T
    wa = jax.random.uniform(k1, (input_size, hidden_size), dtype, -bound, bound)
    ba = jax.random.uniform(k2, (hidden_size,), dtype, -bound, bound)
    wg = jax.random.uniform(k3, (input_size, hidden_size), dtype, -bound, bound)
    bg = jax.random.uniform(k4, (hidden_size,), dtype, -bound, bound)
    return wa, ba, wg, bg


if __name__ == "__main__":
    # TODO(synk): dropout_rate path omitted (module is used with
    # dropout_rate=None; eval-mode dropout is identity anyway).
    key = jax.random.PRNGKey(0)
    kx, kp, kx2, kp2 = jax.random.split(key, 4)

    # --- small shape matching the module's typical use -----------------------
    batch, seq, input_size, hidden = 2, 8, 32, 32
    x = jax.random.normal(kx, (batch, seq, input_size), dtype=jnp.float32)
    wa, ba, wg, bg = init_glu_params(kp, input_size, hidden)

    act_gated, gate = glu_forward(x, wa, ba, wg, bg)
    jax.block_until_ready((act_gated, gate))

    ref_act = x @ wa + ba
    ref_gate = jax.nn.sigmoid(x @ wg + bg)
    assert act_gated.shape == ref_act.shape and gate.shape == ref_gate.shape
    assert jnp.allclose(act_gated, ref_act * ref_gate, atol=1e-5, rtol=1e-5)
    assert jnp.allclose(gate, ref_gate, atol=1e-5, rtol=1e-5)

    # --- larger shape: exercises M tiling + ragged tail, H padding, N tiling --
    batch2, seq2, input2, hidden2 = 4, 160, 64, 200
    x_l = jax.random.normal(kx2, (batch2, seq2, input2), dtype=jnp.float32)
    wa2, ba2, wg2, bg2 = init_glu_params(kp2, input2, hidden2)
    ag_l, g_l = glu_forward(x_l, wa2, ba2, wg2, bg2, tile_m=256, tile_n=128)
    jax.block_until_ready((ag_l, g_l))
    ref_act2 = x_l @ wa2 + ba2
    ref_gate2 = jax.nn.sigmoid(x_l @ wg2 + bg2)
    assert jnp.allclose(ag_l, ref_act2 * ref_gate2, atol=1e-4, rtol=1e-4)
    assert jnp.allclose(g_l, ref_gate2, atol=1e-4, rtol=1e-4)

    # --- bf16 matmul path (v6e/v7x-oriented), f32 epilogue, looser tolerance --
    ag_bf, g_bf = glu_forward(x, wa, ba, wg, bg, use_bf16_matmul=True)
    jax.block_until_ready((ag_bf, g_bf))
    assert jnp.allclose(ag_bf, ref_act * ref_gate, atol=5e-2, rtol=5e-2)
    assert jnp.allclose(g_bf, ref_gate, atol=5e-2, rtol=5e-2)

    print("KERNEL_OK")
</pallas_src>

<mosaic_0001>
module attributes {stable_mosaic.version = 11 : i64} {
  func.func @_glu_kernel(%arg0: i32, %arg1: i32, %arg2: memref<16x32xf32, #tpu.memory_space<vmem>>, %arg3: memref<32x256xf32, #tpu.memory_space<vmem>>, %arg4: memref<1x256xf32, #tpu.memory_space<vmem>>, %arg5: memref<16x256xf32, #tpu.memory_space<vmem>>) attributes {dimension_semantics = [#tpu.dimension_semantics<parallel>, #tpu.dimension_semantics<parallel>], iteration_bounds = array<i64: 1, 1>, scalar_prefetch = 0 : i64, scratch_operands = 0 : i64, tpu.core_type = #tpu.core_type<tc>, window_params = [{transform_indices = @transform_0, window_bounds = array<i64: 16, 32>}, {transform_indices = @transform_1, window_bounds = array<i64: 32, 256>}, {transform_indices = @transform_2, window_bounds = array<i64: 1, 256>}, {transform_indices = @transform_3, window_bounds = array<i64: 16, 256>}]} {
    %c0 = arith.constant 0 : index
    %c0_0 = arith.constant 0 : index
    %0 = vector.load %arg2[%c0, %c0_0] : memref<16x32xf32, #tpu.memory_space<vmem>>, vector<16x32xf32>
    %c0_1 = arith.constant 0 : index
    %c0_2 = arith.constant 0 : index
    %1 = vector.load %arg3[%c0_1, %c0_2] : memref<32x256xf32, #tpu.memory_space<vmem>>, vector<32x256xf32>
    %cst = arith.constant dense<0.000000e+00> : vector<16x256xf32>
    %2 = tpu.matmul %0, %1, %cst {dimension_numbers = #tpu.dot_dimension_numbers<[1], [0], [0], [1], [0, 0, 1, 1], [], []>} : vector<16x32xf32>, vector<32x256xf32>, vector<16x256xf32> -> vector<16x256xf32>
    %c0_3 = arith.constant 0 : index
    %c0_4 = arith.constant 0 : index
    %3 = vector.load %arg4[%c0_3, %c0_4] : memref<1x256xf32, #tpu.memory_space<vmem>>, vector<1x256xf32>
    %4 = vector.broadcast %3 : vector<1x256xf32> to vector<16x256xf32>
    %5 = arith.addf %2, %4 : vector<16x256xf32>
    %6 = vector.extract_strided_slice %5 {offsets = [0, 0], sizes = [16, 128], strides = [1, 1]} : vector<16x256xf32> to vector<16x128xf32>
    %7 = vector.extract_strided_slice %5 {offsets = [0, 128], sizes = [16, 128], strides = [1, 1]} : vector<16x256xf32> to vector<16x128xf32>
    %8 = arith.negf %7 : vector<16x128xf32>
    %9 = math.exp %8 : vector<16x128xf32>
    %cst_5 = arith.constant 1.000000e+00 : f32
    %10 = vector.broadcast %cst_5 : f32 to vector<16x128xf32>
    %11 = arith.addf %10, %9 : vector<16x128xf32>
    %12 = arith.divf %10, %11 : vector<16x128xf32>
    %13 = arith.mulf %6, %12 : vector<16x128xf32>
    %14 = tpu.concatenate %13, %12 in 1 : vector<16x128xf32>, vector<16x128xf32> -> vector<16x256xf32>
    %c0_6 = arith.constant 0 : index
    %c0_7 = arith.constant 0 : index
    %15 = vector.load %arg5[%c0_6, %c0_7] : memref<16x256xf32, #tpu.memory_space<vmem>>, vector<16x256xf32>
    tpu.vector_store %arg5[%c0_6, %c0_7], %14 {strides = array<i32>} : memref<16x256xf32, #tpu.memory_space<vmem>>, vector<16x256xf32>,
    return
  }
  func.func @transform_0(%arg0: i32, %arg1: i32) -> (i32, i32) {
    %c0_i32 = arith.constant 0 : i32
    %c0_i32_0 = arith.constant 0 : i32
    return %arg0, %c0_i32 : i32, i32
  }
  func.func @transform_1(%arg0: i32, %arg1: i32) -> (i32, i32) {
    %c0_i32 = arith.constant 0 : i32
    %c0_i32_0 = arith.constant 0 : i32
    return %c0_i32, %arg1 : i32, i32
  }
  func.func @transform_2(%arg0: i32, %arg1: i32) -> (i32, i32) {
    %c0_i32 = arith.constant 0 : i32
    %c0_i32_0 = arith.constant 0 : i32
    return %c0_i32, %arg1 : i32, i32
  }
  func.func @transform_3(%arg0: i32, %arg1: i32) -> (i32, i32) {
    %c0_i32 = arith.constant 0 : i32
    return %arg0, %arg1 : i32, i32
  }
}

</mosaic_0001>

<bundles_post_ra>
// kernel: tpu_custom_call.1
= control target key start
LH: loop header
LB: loop body
LE: loop exit
PB: predicated region body
PF: predicated region fallthrough
CT: control target
= control target key end

     0   :  { %8 = vsyncpa [#allocation3], 0  ;;  %s362_s0 = inlined_call_operand.hbm [shape: f32[16,32], index: 0, kind: input, shape index: {}]   ;;  %s363_s1 = inlined_call_operand.hbm [shape: f32[32,256], index: 1, kind: input, shape index: {}]   ;;  %s364_s2 = inlined_call_operand.vmem [shape: f32[1,256], index: 2, kind: input, shape index: {}]   ;;  %s365_s3 = inlined_call_operand.hbm [shape: f32[16,256], index: 3, kind: output, shape index: {}]  }
   0x1   :  { %9 = vsyncpa [#allocation6], 0 }
   0x2   :  { %10 = vsyncpa [#allocation4], 0  ;;  %s289_s12 = smov [#allocation2]   ;;  %s217_s16 = scalar_lea.hbm %s362_s0, 256 }
   0x3   :  { %s16_s13 = sshll.u32 %s289_s12, 4  ;;  %p218_p0 = scmp.ne.s32.totalorder %s362_s0, %s217_s16  ;;  %s17_s13 = int_to_ptr.vmem [resolvable:$true] %s16_s13 }
   0x4   :  { %p221_p1 = scmp.lt.u32.totalorder %s217_s16, %s362_s0 }
   0x6   :  { %p223_p2 = pnand %p221_p1, %p218_p0 }
   0x8   :  { %226 = shalt.err (!%p223_p2)
}
   0x9   :  { %s227_s21 = scalar_lea.vmem %s17_s13, 256  ;;  %p232_p4 = scmp.lt.s32.totalorder %s17_s13, %s17_s13 }
   0xa   :  { %p228_p3 = scmp.ne.s32.totalorder %s17_s13, %s227_s21  ;;  %p233_p5 = scmp.lt.s32.totalorder %s227_s21, %s227_s21 }
   0xc   :  { %p234_p6 = por %p233_p5, %p232_p4 }
   0xe   :  { %p235_p7 = pnand %p234_p6, %p228_p3 }
  0x10   :  { %238 = shalt.err (!%p235_p7)
}
  0x11   :  { %s290_s22 = smov 128   ;;  %s291_s23 = smov 8  }
  0x12   :  { %22 = dma.hbm_to_vmem [thread:$0]  %s362_s0, 256, %s17_s13, [#allocation3], %s290_s22, %s290_s22, %s291_s23  }
  0x13   :  { %s292_s26 = smov [#allocation5]   ;;  %s239_s30 = scalar_lea.hbm %s363_s1, 1024 }
  0x14   :  { %s28_s27 = sshll.u32 %s292_s26, 4  ;;  %p240_p8 = scmp.ne.s32.totalorder %s363_s1, %s239_s30  ;;  %s29_s27 = int_to_ptr.vmem [resolvable:$true] %s28_s27 }
  0x15   :  { %p243_p9 = scmp.lt.u32.totalorder %s239_s30, %s363_s1 }
  0x17   :  { %p245_p10 = pnand %p243_p9, %p240_p8 }
  0x19   :  { %248 = shalt.err (!%p245_p10)
}
  0x1a   :  { %s249_s8 = scalar_lea.vmem %s29_s27, 1024  ;;  %p254_p12 = scmp.lt.s32.totalorder %s29_s27, %s29_s27 }
  0x1b   :  { %p250_p11 = scmp.ne.s32.totalorder %s29_s27, %s249_s8  ;;  %p255_p13 = scmp.lt.s32.totalorder %s249_s8, %s249_s8 }
  0x1d   :  { %p256_p0 = por %p255_p13, %p254_p12 }
  0x1f   :  { %p257_p1 = pnand %p256_p0, %p250_p11 }
  0x21   :  { %260 = shalt.err (!%p257_p1)
}
  0x22   :  { %s293_s0 = smov 256   ;;  %s294_s9 = smov 16  }
  0x23   :  { %34 = dma.hbm_to_vmem [thread:$0]  %s363_s1, 1024, %s29_s27, [#allocation6], %s293_s0, %s293_s0, %s294_s9  }
  0x24   :  { %283 = dma.done.wait [#allocation3], 256  }
  0x25   :  { %284 = vsyncadd [#allocation3], 4294967040 }
  0x26   :  { %285 = dma.done.wait [#allocation6], 1024  }
  0x27   :  { %286 = vsyncadd [#allocation6], 4294966272  ;;  %v295_v0 = vmov 0.0   ;;  %v46_v1 = vld [vmem:[#allocation5 + $0x8] sm:$0xff]  ;;  %v48_v2 = vld [vmem:[#allocation5 + $0x18] sm:$0xff]  ;;  %vm65_vm0 = vcmask 261120   ;;  %v55_v15 = vlaneseq }
  0x28   :  { %136 = vmatprep.mubr.f32.mxu0 %v295_v0  ;;  %142 = vmatprep.mubr.f32.mxu1 %v295_v0  ;;  %v45_v3 = vld [vmem:[#allocation5] sm:$0xff]  ;;  %v189_v4 = vpack.c.bf16 %v48_v2, %v46_v1  ;;  %v47_v5 = vld [vmem:[#allocation5 + $0x10] sm:$0xff]  ;;  %v50_v6 = vld [vmem:[#allocation5 + $0x28] sm:$0xff] }
  0x29   :  { %v52_v7 = vld [vmem:[#allocation5 + $0x38] sm:$0xff]  ;;  %v191_v8 = vpack.c.bf16 %v47_v5, %v45_v3  ;;  %v49_v10 = vld [vmem:[#allocation5 + $0x20] sm:$0xff]  ;;  %v51_v11 = vld [vmem:[#allocation5 + $0x30] sm:$0xff]  ;;  %v56_v16 = vshrl.u32 %v55_v15, 7 }
  0x2a   :  { %v193_v9 = vpack.c.bf16 %v52_v7, %v50_v6  ;;  %190 = vmatprep.subr.bf16.mxu0 %v189_v4  ;;  %197 = vmatprep.subr.bf16.mxu1 %v189_v4  ;;  %v195_v12 = vpack.c.bf16 %v51_v11, %v49_v10  ;;  %v43_v13 = vld [vmem:[#allocation2] sm:$0xff]  ;;  %v44_v14 = vld [vmem:[#allocation2 + $0x8] sm:$0xff] }
  0x2b   :  { %192 = vmatpush1.bf16.msra.mxu0 %v191_v8  ;;  %199 = vmatpush1.bf16.msra.mxu1 %v191_v8  ;;  %v61_v17 = vsub.s32 1, %v56_v16  ;;  %v53_v18 = vld [vmem:[%s364_s2] sm:$0x3]  ;;  %v57_v32 = vsub.s32 0, %v56_v16  ;;  %s296_s2 = smov [#allocation7]  }
  0x2c   :  { %194 = vmatprep.subr.bf16.mxu0 %v193_v9  ;;  %198 = vmatprep.subr.bf16.mxu1 %v193_v9  ;;  %s172_s13 = sshll.u32 %s296_s2, 4  ;;  %s173_s13 = int_to_ptr.vmem [resolvable:$true] %s172_s13 }
  0x2d   :  { %v62_v19 = vrot.slane %v53_v18, %v61_v17  ;;  %v58_v33 = vrot.slane %v53_v18, %v57_v32  ;;  %s261_s14 = scalar_lea.vmem %s173_s13, 512  ;;  %p266_p3 = scmp.lt.s32.totalorder %s173_s13, %s173_s13 }
  0x2e   :  { %p262_p2 = scmp.ne.s32.totalorder %s173_s13, %s261_s14  ;;  %p267_p4 = scmp.lt.s32.totalorder %s261_s14, %s261_s14 }
  0x2f   :  { %196 = vmatpush1.bf16.msra.mxu0 %v195_v12  ;;  %200 = vmatpush1.bf16.msra.mxu1 %v195_v12 }
  0x30   :  { %p268_p5 = por %p267_p4, %p266_p3 }
  0x32   :  { %185 = vmatmul.mubr.msk.f32.vlgmr.msra.gmra.mrb[0].mxu0 %vm65_vm0, %v43_v13  ;;  %186 = vmatmul.mubr.msk.f32.vlgmr.msra.gmra.mrb[0].mxu1 %vm65_vm0, %v44_v14  ;;  %p269_p6 = pnand %p268_p5, %p262_p2 }
 0x105   :  { %v138_v20 = vpop.f32.mrb[0].mxu0  ;;  %v144_v21 = vpop.f32.mrb[0].mxu1 }
 0x106   :  { %v140_v22 = vpop.f32.mrb[1].mxu0  ;;  %v146_v23 = vpop.f32.mrb[1].mxu1  ;;  %v139_v34 = vadd.f32 %v138_v20, %v58_v33  ;;  %v145_v36 = vadd.f32 %v144_v21, %v58_v33 }
 0x107   :  { %v141_v24 = vadd.f32 %v140_v22, %v62_v19  ;;  %v147_v25 = vadd.f32 %v146_v23, %v62_v19 }
 0x109   :  { %v187_v26 = vmul.f32 -1.442695, %v141_v24  ;;  %v188_v27 = vmul.f32 -1.442695, %v147_v25 }
 0x10b   :  { %209 = vpow2.f32 %v187_v26 }
 0x10c   :  { %211 = vpow2.f32 %v188_v27 }
 0x115   :  { %v210_v28 = vpop.eup %209 }
 0x116   :  { %v212_v29 = vpop.eup %211  ;;  %v155_v30 = vadd.f32 1.0, %v210_v28 }
 0x117   :  { %v156_v31 = vadd.f32 1.0, %v212_v29 }
 0x118   :  { %213 = vrcp.f32 %v155_v30 }
 0x119   :  { %215 = vrcp.f32 %v156_v31 }
 0x122   :  { %v214_v35 = vpop.eup %213 }
 0x123   :  { %v216_v37 = vpop.eup %215  ;;  %164 = vst [vmem:[#allocation7 + $0x8] sm:$0xff] %v214_v35  ;;  %v161_v38 = vmul.f32 %v214_v35, %v139_v34 }
 0x124   :  { %166 = vst [vmem:[#allocation7 + $0x18] sm:$0xff] %v216_v37  ;;  %v162_v39 = vmul.f32 %v216_v37, %v145_v36 }
 0x125   :  { %163 = vst [vmem:[#allocation7] sm:$0xff] %v161_v38 }
 0x126   :  { %165 = vst [vmem:[#allocation7 + $0x10] sm:$0xff] %v162_v39 }
 0x127   :  { %272 = shalt.err (!%p269_p6)
}
 0x128   :  { %s273_s17 = scalar_lea.hbm %s365_s3, 512 }
 0x129   :  { %p274_p7 = scmp.ne.s32.totalorder %s365_s3, %s273_s17  ;;  %p277_p8 = scmp.lt.u32.totalorder %s273_s17, %s365_s3 }
 0x12b   :  { %p279_p9 = pnand %p277_p8, %p274_p7 }
 0x12d   :  { %282 = shalt.err (!%p279_p9)
}
 0x12e   :  { %178 = dma.vmem_to_hbm [thread:$0]  %s173_s13, 512, %s365_s3, [#allocation4], %s293_s0, %s293_s0, %s294_s9  }
 0x12f   :  { %287 = dma.done.wait [#allocation4], 512  }
 0x130   :  { %288 = vsyncadd [#allocation4], 4294966784 }
 0x131   :  { %182 = vsyncpa [#allocation3], 1 }
 0x132   :  { %183 = vsyncpa [#allocation6], 1 }
 0x133   :  { %184 = vsyncpa [#allocation4], 1 }

</bundles_post_ra>
